<compile_context>
chip_gen: v6e
topology: v6e:2x2x1
jax: 0.10.0
libtpu: 0.0.40
codegen_flags: <defaults>
</compile_context>

<pallas_src>
import functools

import numpy as np

import jax
import jax.numpy as jnp
from jax import lax
from jax.experimental import pallas as pl
from jax.experimental.pallas import tpu as pltpu


def _round_up(x, m):
    return ((x + m - 1) // m) * m


def _vmem_budget_bytes():
    """Per-generation VMEM budget: ~3/4 of physical VMEM, capped at 100 MiB.

    v5e/v6e (128 MiB physical) -> ~96 MiB; v7x (64 MiB) -> 48 MiB.  Falls back
    to a conservative 48 MiB if the hardware query is unavailable.
    """
    try:
        info_fn = getattr(pltpu, "get_tpu_info", None)
        if info_fn is not None:
            cap = getattr(info_fn(), "vmem_capacity_bytes", None)
            if cap:
                return min((3 * int(cap)) // 4, 100 * 1024 * 1024)
    except Exception:
        pass
    return 48 * 1024 * 1024


def _pick_tq(n_pad, c, c8_pad, with_attn, budget_bytes):
    """Largest 128-multiple query tile dividing n_pad that fits the budget."""
    r = 2 * c8_pad + c + 8
    resident = r * n_pad * 2 + c * n_pad * 4          # bf16 QKV scratch + f32 x scratch
    for t in (1024, 512, 256, 128):
        if n_pad % t:
            continue
        tile = t * n_pad * 4                          # energy (f32)
        tile += t * n_pad * 2                         # p (bf16 MXU operand)
        tile += 2 * c * t * 4                         # double-buffered out block
        if with_attn:
            tile += t * n_pad * 4                     # f32 exp kept live for the map
            tile += 2 * t * n_pad * 4                 # double-buffered attn out block
        if resident + tile <= (budget_bytes * 4) // 5:  # headroom for Mosaic scratch
            return t
    return 128                                        # n_pad is always a 128-multiple


def pack_qkv_params(wq, bq, wk, bk, wv, bv, compute_dtype=jnp.bfloat16):
    """Pack the three 1x1-conv weights into one sublane-aligned matrix.

    Row layout of the packed (R, C) weight / (R, 1) bias:
      [ q rows (C//8, zero-padded to a multiple of 8)
      | k rows (same)
      | v rows (C)
      | 1 "ones" row (weight 0, bias 1) + 7 zero rows ]
    The ones row makes the fused-QKV scratch carry an all-ones row, so the AV
    matmul also yields the softmax row sums straight from the MXU.
    Done once at init (hoisted out of the per-call jit path).
    """
    C8, C = wq.shape
    if C % 8 != 0:
        raise ValueError("Self_Attn Pallas kernel requires in_dim % 8 == 0")
    c8p = _round_up(max(C8, 1), 8)
    R = 2 * c8p + C + 8
    w = np.zeros((R, C), np.float32)
    w[0:C8] = np.asarray(wq)
    w[c8p:c8p + C8] = np.asarray(wk)
    w[2 * c8p:2 * c8p + C] = np.asarray(wv)
    b = np.zeros((R, 1), np.float32)
    b[0:C8, 0] = np.asarray(bq)
    b[c8p:c8p + C8, 0] = np.asarray(bk)
    b[2 * c8p:2 * c8p + C, 0] = np.asarray(bv)
    b[2 * c8p + C, 0] = 1.0                 # the MXU row-sum "ones" row
    return jnp.asarray(w, compute_dtype), jnp.asarray(b, jnp.float32)


def _self_attn_kernel(x_hbm, w_ref, b_ref, gamma_ref, out_ref, *rest,
                      with_attn, tq, c, c8_pad, n_valid, n_pad, compute_dtype):
    if with_attn:
        attn_ref, qkv_s, x_vmem, x_sem = rest
    else:
        attn_ref = None
        qkv_s, x_vmem, x_sem = rest

    bi = pl.program_id(0)
    qi = pl.program_id(1)

    # ---- Per-batch setup (query tile 0): copy x once into single-buffered
    # VMEM (replaces a double-buffered (C, N) auto-pipelined block) and cache
    # the fused Q/K/V projection in bf16 scratch for all query tiles.
    @pl.when(qi == 0)
    def _():
        cp = pltpu.make_async_copy(x_hbm.at[bi], x_vmem, x_sem)
        cp.start()
        cp.wait()
        xc = x_vmem[...].astype(compute_dtype)                            # (C, N)
        proj = jnp.dot(w_ref[...], xc,
                       preferred_element_type=jnp.float32)                # (R, N) f32
        # Padded q/k rows have zero weight+bias -> zero rows; the row at
        # index 2*c8_pad + c has zero weight and bias 1.0 -> an all-ones row.
        qkv_s[...] = (proj + b_ref[...]).astype(qkv_s.dtype)

    start = pl.multiple_of(qi * tq, tq)

    q_t = qkv_s[pl.ds(0, c8_pad), pl.ds(start, tq)]                       # (C8p, TQ)
    k_all = qkv_s[pl.ds(c8_pad, c8_pad), :]                               # (C8p, N)
    # The only in-kernel transpose is this tiny (C8p, TQ) tile; keep it on
    # the well-supported 32-bit XLU path (negligible cast cost).
    q_td = q_t.astype(jnp.float32).T.astype(compute_dtype)                # (TQ, C8p)

    # energy[t, j] = sum_c q[c, t] * k[c, j]; bf16 MXU operands, f32 accum.
    energy = jnp.dot(q_td, k_all, preferred_element_type=jnp.float32)     # (TQ, N)

    if n_pad != n_valid:
        # Padded key columns (zero-padded x => bias-only K/V) must not get
        # attention weight: mask them to -inf before the softmax.
        key_idx = lax.broadcasted_iota(jnp.int32, (1, n_pad), 1)
        energy = jnp.where(key_idx < n_valid, energy, -jnp.inf)

    # Softmax over keys (lane axis), f32, max-stabilized; exp output goes
    # straight to the MXU operand dtype so only `energy` stays f32 per tile.
    e_max = jnp.max(energy, axis=-1, keepdims=True)                       # (TQ, 1)
    p_f32 = jnp.exp(energy - e_max)                                       # (TQ, N)
    p = p_f32.astype(compute_dtype)                                       # (TQ, N)

    # AV on the UNnormalized weights, contract last/last (same NT pattern as
    # the flash-attention reference, no full-tile transpose).  The appended
    # ones row gives the softmax row sums in out_aug[c, :], already oriented
    # along TQ, so normalization is a (C, TQ) multiply instead of (TQ, N).
    va = qkv_s[pl.ds(2 * c8_pad, c + 8), :]                               # (C+8, N)
    out_aug = lax.dot_general(va, p, (((1,), (1,)), ((), ())),
                              preferred_element_type=jnp.float32)         # (C+8, TQ)
    denom = out_aug[c:c + 1, :]                                           # (1, TQ)
    inv = pl.reciprocal(denom, approx=not with_attn)
    out_t = out_aug[:c, :] * inv                                          # (C, TQ)

    gamma = gamma_ref[0]
    x_t = x_vmem[:, pl.ds(start, tq)]                                     # (C, TQ) f32
    out_ref[0] = (gamma * out_t + x_t).astype(out_ref.dtype)

    if with_attn:
        den_q = jnp.sum(p_f32, axis=-1, keepdims=True)                    # (TQ, 1)
        attn_ref[0] = (p_f32 * pl.reciprocal(den_q, approx=False)
                       ).astype(attn_ref.dtype)


@functools.partial(jax.jit,
                   static_argnames=("return_attention", "tq", "compute_dtype"))
def self_attn_forward(x_nchw, w_packed, b_packed, gamma, *,
                      return_attention=False, tq=None,
                      compute_dtype=jnp.bfloat16):
    """SAGAN Self_Attn forward.

    Args:
      x_nchw: (B, C, W, H) float32
      w_packed, b_packed: outputs of pack_qkv_params (packed once at init)
      gamma: (1,) float32
    Returns:
      out (B, C, W, H)   [matches the PyTorch forward, which returns only out]
      plus attention (B, N, N) if return_attention=True.
    """
    B, C, W, H = x_nchw.shape
    if C % 8 != 0:
        raise ValueError("Self_Attn Pallas kernel requires in_dim % 8 == 0")
    N = W * H
    R = w_packed.shape[0]
    c8_pad = (R - C - 8) // 2
    n_pad = _round_up(N, 128)

    x_bcn = x_nchw.reshape(B, C, N)
    if n_pad != N:
        x_bcn = jnp.pad(x_bcn, ((0, 0), (0, 0), (0, n_pad - N)))

    budget = _vmem_budget_bytes()
    if tq is None:
        tq = _pick_tq(n_pad, C, c8_pad, return_attention, budget)
    assert n_pad % tq == 0
    n_q = n_pad // tq

    kernel = functools.partial(
        _self_attn_kernel, with_attn=return_attention, tq=tq, c=C,
        c8_pad=c8_pad, n_valid=N, n_pad=n_pad, compute_dtype=compute_dtype)

    out_shape = [jax.ShapeDtypeStruct((B, C, n_pad), jnp.float32)]
    out_specs = [pl.BlockSpec((1, C, tq), lambda b, q: (b, 0, q))]
    if return_attention:
        out_shape.append(jax.ShapeDtypeStruct((B, n_pad, n_pad), jnp.float32))
        out_specs.append(pl.BlockSpec((1, tq, n_pad), lambda b, q: (b, q, 0)))

    res = pl.pallas_call(
        kernel,
        out_shape=tuple(out_shape),
        grid_spec=pltpu.PrefetchScalarGridSpec(
            num_scalar_prefetch=0,
            grid=(B, n_q),
            in_specs=[
                pl.BlockSpec(memory_space=pl.ANY),                  # x: raw HBM, one copy/batch
                pl.BlockSpec((R, C), lambda b, q: (0, 0)),          # packed W_qkv (bf16)
                pl.BlockSpec((R, 1), lambda b, q: (0, 0)),          # packed bias (f32)
                pl.BlockSpec(memory_space=pltpu.MemorySpace.SMEM),  # gamma scalar
            ],
            out_specs=tuple(out_specs),
            scratch_shapes=[
                pltpu.VMEM((R, n_pad), compute_dtype),              # cached Q/K/V (+ ones row)
                pltpu.VMEM((C, n_pad), jnp.float32),                # x, single-buffered
                pltpu.SemaphoreType.DMA(()),
            ],
        ),
        compiler_params=pltpu.CompilerParams(
            dimension_semantics=("parallel", "arbitrary"),
            vmem_limit_bytes=budget),
    )(x_bcn, w_packed, b_packed, gamma)

    out_nchw = res[0][:, :, :N].reshape(B, C, W, H)
    if return_attention:
        return out_nchw, res[1][:, :N, :N]
    return out_nchw


def _reference(x_nchw, wq, bq, wk, bk, wv, bv, gamma):
    B, C, W, H = x_nchw.shape
    N = W * H
    xf = x_nchw.reshape(B, C, N)                                  # (B, C, N)
    q = jnp.einsum('oc,bcn->bon', wq, xf) + bq[None, :, None]     # (B, C8, N)
    k = jnp.einsum('oc,bcn->bon', wk, xf) + bk[None, :, None]
    v = jnp.einsum('oc,bcn->bon', wv, xf) + bv[None, :, None]     # (B, C, N)
    energy = jnp.einsum('bci,bcj->bij', q, k)                     # (B, N, N)
    attn = jax.nn.softmax(energy, axis=-1)
    out = jnp.einsum('bcj,bij->bci', v, attn).reshape(B, C, W, H)
    return gamma[0] * out + x_nchw, attn


if __name__ == "__main__":
    def run_case(B, C, W, H, key):
        C8 = C // 8
        N = W * H
        kx, kq, kk, kv, kbq, kbk, kbv = jax.random.split(key, 7)
        x = jax.random.normal(kx, (B, C, W, H), dtype=jnp.float32)
        wq = 0.1 * jax.random.normal(kq, (C8, C), dtype=jnp.float32)
        wk = 0.1 * jax.random.normal(kk, (C8, C), dtype=jnp.float32)
        wv = 0.1 * jax.random.normal(kv, (C, C), dtype=jnp.float32)
        bq = 0.01 * jax.random.normal(kbq, (C8,), dtype=jnp.float32)
        bk = 0.01 * jax.random.normal(kbk, (C8,), dtype=jnp.float32)
        bv = 0.01 * jax.random.normal(kbv, (C,), dtype=jnp.float32)

        # Weight packing is done once, outside the per-call jit path.
        w_packed, b_packed = pack_qkv_params(wq, bq, wk, bk, wv, bv)

        gamma0 = jnp.zeros((1,), dtype=jnp.float32)      # matches nn.Parameter(torch.zeros(1))
        gamma1 = jnp.full((1,), 0.5, dtype=jnp.float32)  # non-zero gamma exercises attention path

        out0 = self_attn_forward(x, w_packed, b_packed, gamma0)
        out1, attn1 = self_attn_forward(x, w_packed, b_packed, gamma1,
                                        return_attention=True)
        out0, out1, attn1 = jax.block_until_ready((out0, out1, attn1))

        ref0, _ = _reference(x, wq, bq, wk, bk, wv, bv, gamma0)
        ref1, ref_attn = _reference(x, wq, bq, wk, bk, wv, bv, gamma1)

        assert out0.shape == (B, C, W, H) and out1.shape == (B, C, W, H)
        assert attn1.shape == (B, N, N)
        # bf16 MXU operands + approx reciprocal -> slightly looser tolerances.
        assert jnp.allclose(out0, ref0, atol=2e-2, rtol=2e-2)
        assert jnp.allclose(out1, ref1, atol=2e-2, rtol=2e-2)
        assert jnp.allclose(attn1, ref_attn, atol=5e-3, rtol=5e-2)

    key = jax.random.PRNGKey(0)
    k1, k2 = jax.random.split(key)
    run_case(2, 16, 16, 16, k1)   # N = 256 (already 128-aligned)
    run_case(1, 16, 12, 12, k2)   # N = 144 -> exercises key padding + -inf mask

    print("KERNEL_OK")
</pallas_src>

<mosaic_0001>
module attributes {stable_mosaic.version = 11 : i64} {
  func.func @_self_attn_kernel(%arg0: i32, %arg1: i32, %arg2: memref<2x16x256xf32, #tpu.memory_space<any>>, %arg3: memref<40x16xbf16, #tpu.memory_space<vmem>>, %arg4: memref<40x1xf32, #tpu.memory_space<vmem>>, %arg5: memref<1xf32, #tpu.memory_space<smem>>, %arg6: memref<1x16x256xf32, #tpu.memory_space<vmem>>, %arg7: memref<40x256xbf16, #tpu.memory_space<vmem>>, %arg8: memref<16x256xf32, #tpu.memory_space<vmem>>, %arg9: memref<!tpu.dma_semaphore, #tpu.memory_space<semaphore_mem>>) attributes {dimension_semantics = [#tpu.dimension_semantics<parallel>, #tpu.dimension_semantics<arbitrary>], iteration_bounds = array<i64: 2, 1>, scalar_prefetch = 0 : i64, scratch_operands = 3 : i64, tpu.core_type = #tpu.core_type<tc>, window_params = [{}, {pipeline_mode = #tpu.pipeline_mode<synchronous>, transform_indices = @transform_1, window_bounds = array<i64: 40, 16>}, {pipeline_mode = #tpu.pipeline_mode<synchronous>, transform_indices = @transform_2, window_bounds = array<i64: 40, 1>}, {transform_indices = @transform_3, window_bounds = array<i64: 1>}, {transform_indices = @transform_4, window_bounds = array<i64: 1, 16, 256>}]} {
    %c0_i32 = arith.constant 0 : i32
    %0 = arith.cmpi eq, %arg1, %c0_i32 : i32
    %1 = arith.extui %0 : i1 to i32
    %c0_i32_0 = arith.constant 0 : i32
    %2 = arith.cmpi ne, %1, %c0_i32_0 : i32
    scf.if %2 {
      %c0_i32_10 = arith.constant 0 : i32
      %c0_i32_11 = arith.constant 0 : i32
      %34 = tpu.memref_slice %arg2[%arg0, %c0_i32_10, %c0_i32_11] : memref<2x16x256xf32, #tpu.memory_space<any>> -> memref<1x16x256xf32, #tpu.memory_space<any>>
      %35 = tpu.memref_squeeze %34 : memref<1x16x256xf32, #tpu.memory_space<any>> -> memref<16x256xf32, #tpu.memory_space<any>>
      tpu.enqueue_dma source(%35 : memref<16x256xf32, #tpu.memory_space<any>>) target(%arg8 : memref<16x256xf32, #tpu.memory_space<vmem>>) target_semaphore(%arg9 : memref<!tpu.dma_semaphore, #tpu.memory_space<semaphore_mem>>)
      %c0_i32_12 = arith.constant 0 : i32
      %c0_i32_13 = arith.constant 0 : i32
      %36 = tpu.memref_slice %arg2[%arg0, %c0_i32_12, %c0_i32_13] : memref<2x16x256xf32, #tpu.memory_space<any>> -> memref<1x16x256xf32, #tpu.memory_space<any>>
      %37 = tpu.memref_squeeze %36 : memref<1x16x256xf32, #tpu.memory_space<any>> -> memref<16x256xf32, #tpu.memory_space<any>>
      tpu.wait_dma2 semaphore(%arg9 : memref<!tpu.dma_semaphore, #tpu.memory_space<semaphore_mem>>) src(%37 : memref<16x256xf32, #tpu.memory_space<any>>) dst(%arg8 : memref<16x256xf32, #tpu.memory_space<vmem>>)
      %c0_14 = arith.constant 0 : index
      %c0_15 = arith.constant 0 : index
      %38 = vector.load %arg8[%c0_14, %c0_15] : memref<16x256xf32, #tpu.memory_space<vmem>>, vector<16x256xf32>
      %39 = arith.truncf %38 : vector<16x256xf32> to vector<16x256xbf16>
      %c0_16 = arith.constant 0 : index
      %c0_17 = arith.constant 0 : index
      %40 = vector.load %arg3[%c0_16, %c0_17] : memref<40x16xbf16, #tpu.memory_space<vmem>>, vector<40x16xbf16>
      %cst_18 = arith.constant dense<0.000000e+00> : vector<40x256xf32>
      %41 = tpu.matmul %40, %39, %cst_18 {dimension_numbers = #tpu.dot_dimension_numbers<[1], [0], [0], [1], [0, 0, 1, 1], [], []>} : vector<40x16xbf16>, vector<16x256xbf16>, vector<40x256xf32> -> vector<40x256xf32>
      %c0_19 = arith.constant 0 : index
      %c0_20 = arith.constant 0 : index
      %42 = vector.load %arg4[%c0_19, %c0_20] : memref<40x1xf32, #tpu.memory_space<vmem>>, vector<40x1xf32>
      %43 = vector.broadcast %42 : vector<40x1xf32> to vector<40x256xf32>
      %44 = arith.addf %41, %43 : vector<40x256xf32>
      %45 = arith.truncf %44 : vector<40x256xf32> to vector<40x256xbf16>
      %c0_21 = arith.constant 0 : index
      %c0_22 = arith.constant 0 : index
      %46 = vector.load %arg7[%c0_21, %c0_22] : memref<40x256xbf16, #tpu.memory_space<vmem>>, vector<40x256xbf16>
      tpu.vector_store %arg7[%c0_21, %c0_22], %45 {strides = array<i32>} : memref<40x256xbf16, #tpu.memory_space<vmem>>, vector<40x256xbf16>,
    } else {
    }
    %c256_i32 = arith.constant 256 : i32
    %3 = arith.muli %arg1, %c256_i32 : i32
    %4 = tpu.assume_multiple %3, 256 : i32
    %c0 = arith.constant 0 : index
    %5 = arith.index_cast %4 : i32 to index
    %6 = vector.load %arg7[%c0, %5] : memref<40x256xbf16, #tpu.memory_space<vmem>>, vector<8x256xbf16>
    %c8 = arith.constant 8 : index
    %c0_1 = arith.constant 0 : index
    %7 = vector.load %arg7[%c8, %c0_1] : memref<40x256xbf16, #tpu.memory_space<vmem>>, vector<8x256xbf16>
    %8 = arith.extf %6 : vector<8x256xbf16> to vector<8x256xf32>
    %9 = tpu.transpose %8, [1, 0] : vector<8x256xf32> -> vector<256x8xf32>
    %10 = arith.truncf %9 : vector<256x8xf32> to vector<256x8xbf16>
    %cst = arith.constant dense<0.000000e+00> : vector<256x256xf32>
    %11 = tpu.matmul %10, %7, %cst {dimension_numbers = #tpu.dot_dimension_numbers<[1], [0], [0], [1], [0, 0, 1, 1], [], []>} : vector<256x8xbf16>, vector<8x256xbf16>, vector<256x256xf32> -> vector<256x256xf32>
    %cst_2 = arith.constant dense<0xFF800000> : vector<256xf32>
    %12 = vector.multi_reduction <maximumf>, %11, %cst_2 [1] : vector<256x256xf32> to vector<256xf32>
    %13 = vector.shape_cast %12 : vector<256xf32> to vector<256x1xf32>
    %14 = vector.broadcast %13 : vector<256x1xf32> to vector<256x256xf32>
    %15 = arith.subf %11, %14 : vector<256x256xf32>
    %16 = math.exp %15 : vector<256x256xf32>
    %17 = arith.truncf %16 : vector<256x256xf32> to vector<256x256xbf16>
    %c16 = arith.constant 16 : index
    %c0_3 = arith.constant 0 : index
    %18 = vector.load %arg7[%c16, %c0_3] : memref<40x256xbf16, #tpu.memory_space<vmem>>, vector<24x256xbf16>
    %cst_4 = arith.constant dense<0.000000e+00> : vector<24x256xf32>
    %19 = tpu.matmul %18, %17, %cst_4 {dimension_numbers = #tpu.dot_dimension_numbers<[1], [1], [0], [0], [0, 0, 1, 0], [], []>} : vector<24x256xbf16>, vector<256x256xbf16>, vector<24x256xf32> -> vector<24x256xf32>
    %20 = vector.extract_strided_slice %19 {offsets = [16, 0], sizes = [1, 256], strides = [1, 1]} : vector<24x256xf32> to vector<1x256xf32>
    %21 = tpu.reciprocal %20 {approx = true} : vector<1x256xf32> -> vector<1x256xf32>
    %22 = vector.extract_strided_slice %19 {offsets = [0, 0], sizes = [16, 256], strides = [1, 1]} : vector<24x256xf32> to vector<16x256xf32>
    %23 = vector.broadcast %21 : vector<1x256xf32> to vector<16x256xf32>
    %24 = arith.mulf %22, %23 : vector<16x256xf32>
    %c0_5 = arith.constant 0 : index
    %25 = memref.load %arg5[%c0_5] : memref<1xf32, #tpu.memory_space<smem>>
    %c0_6 = arith.constant 0 : index
    %26 = arith.index_cast %4 : i32 to index
    %27 = vector.load %arg8[%c0_6, %26] : memref<16x256xf32, #tpu.memory_space<vmem>>, vector<16x256xf32>
    %28 = vector.broadcast %25 : f32 to vector<16x256xf32>
    %29 = arith.mulf %28, %24 : vector<16x256xf32>
    %30 = arith.addf %29, %27 : vector<16x256xf32>
    %c0_7 = arith.constant 0 : index
    %c0_8 = arith.constant 0 : index
    %c0_9 = arith.constant 0 : index
    %31 = vector.load %arg6[%c0_7, %c0_8, %c0_9] : memref<1x16x256xf32, #tpu.memory_space<vmem>>, vector<1x16x256xf32>
    %32 = vector.shape_cast %31 : vector<1x16x256xf32> to vector<16x256xf32>
    %33 = vector.shape_cast %30 : vector<16x256xf32> to vector<1x16x256xf32>
    tpu.vector_store %arg6[%c0_7, %c0_8, %c0_9], %33 {strides = array<i32>} : memref<1x16x256xf32, #tpu.memory_space<vmem>>, vector<1x16x256xf32>,
    return
  }
  func.func @transform_1(%arg0: i32, %arg1: i32) -> (i32, i32) {
    %c0_i32 = arith.constant 0 : i32
    %c0_i32_0 = arith.constant 0 : i32
    %c0_i32_1 = arith.constant 0 : i32
    return %c0_i32, %c0_i32_0 : i32, i32
  }
  func.func @transform_2(%arg0: i32, %arg1: i32) -> (i32, i32) {
    %c0_i32 = arith.constant 0 : i32
    %c0_i32_0 = arith.constant 0 : i32
    %c0_i32_1 = arith.constant 0 : i32
    return %c0_i32, %c0_i32_0 : i32, i32
  }
  func.func @transform_3(%arg0: i32, %arg1: i32) -> i32 {
    %c0_i32 = arith.constant 0 : i32
    %c0_i32_0 = arith.constant 0 : i32
    return %c0_i32 : i32
  }
  func.func @transform_4(%arg0: i32, %arg1: i32) -> (i32, i32, i32) {
    %c0_i32 = arith.constant 0 : i32
    %c0_i32_0 = arith.constant 0 : i32
    return %arg0, %c0_i32, %arg1 : i32, i32, i32
  }
}

</mosaic_0001>

<bundles_post_ra>
// kernel: self_attn_forward.1
= control target key start
LH: loop header
LB: loop body
LE: loop exit
PB: predicated region body
PF: predicated region fallthrough
CT: control target
= control target key end

     0   :  { %s1564_s17 = smov 0   ;;  %s1566_s18 = smov 0   ;;  %s1957_s0 = inlined_call_operand.vmem [shape: f32[2,16,256], index: 0, kind: input, shape index: {}]   ;;  %s1958_s1 = inlined_call_operand.vmem [shape: bf16[40,16], index: 1, kind: input, shape index: {}]   ;;  %s1959_s2 = inlined_call_operand.vmem [shape: f32[40,1], index: 2, kind: input, shape index: {}]   ;;  %s1960_s3 = inlined_call_operand.<no memory space> [shape: f32[1], index: 3, kind: input, shape index: {}]   ;;  %s1961_s4 = inlined_call_operand.vmem [shape: f32[2,16,256], index: 4, kind: output, shape index: {}]  }
   0x1   :  { %9 = sst [smem:[#allocation5]] %s1960_s3  ;;  %s1568_s19 = smov 0  }
   0x2 LB: > { %s27_s3 = sadd.s32 1, %s1529_s18  ;;  %p1259_p0 = scmp.ge.s32.totalorder %s1533_s19, 1  ;;  %s1533_s19 = sphi %s1568_s19, %s15_s19   ;;  %s1529_s18 = sphi %s1566_s18, %s2022_s18   ;;  %s1525_s17 = sphi %s1564_s17, %s2021_s17  }
   0x3   : > { %p29_p1 = scmp.ge.s32.totalorder %s27_s3, 2  ;;  %p143_p2 = scmp.lt.s32.totalorder %s1533_s19, 3 }
   0x5   : > { %s2024_s3 = smov (%p29_p1, %s27_s3), 0  ;;  %p144_p3 = pnand %p1259_p0, %p143_p2 }
   0x7   : > { %147 = sbr.rel (%p144_p3) target bundleno = 1119 (0x45f), region = 32 }
   0xc   : > { %p167_p4 = scmp.lt.s32.totalorder %s1525_s17, 1  ;;  %s1302_s20 = sshll.u32 %s1525_s17, 5 }
   0xd   : > { %s183_s23 = scalar_lea.vmem %s1957_s0, %s1302_s20 }
   0xe   : > { %s2026_s17 = smov (!%p167_p4, %s1525_s17), 1  ;;  %v1585_v0 = vld [vmem:[%s183_s23] sm:$0xff]  ;;  %v1587_v1 = vld [vmem:[%s183_s23 + $0x8] sm:$0xff]  ;;  %v1589_v2 = vld [vmem:[%s183_s23 + $0x10] sm:$0xff] }
   0xf   : > { %1979 = vst [vmem:[#allocation8_spill] sm:$0xff] %v1585_v0  ;;  %1980 = vst [vmem:[#allocation9_spill] sm:$0xff] %v1587_v1  ;;  %v1591_v3 = vld [vmem:[%s183_s23 + $0x18] sm:$0xff]  ;;  %s1301_s24 = sshll.u32 %s2026_s17, 5 }
  0x10   : > { %1981 = vst [vmem:[#allocation10_spill] sm:$0xff] %v1589_v2  ;;  %1982 = vst [vmem:[#allocation11_spill] sm:$0xff] %v1591_v3  ;;  %s1596_s27 = scalar_lea.vmem %s1961_s4, %s1301_s24 }
  0x11   : > { %232 = vsyncadd [#allocation4], 512 }
  0x12   : > { %1521 = dma.done.wait [#allocation4], 512 }
  0x13   : > { %1522 = vsyncadd [#allocation4], 4294966784  ;;  %v242_v4 = vpack.c.bf16 %v1591_v3, %v1587_v1  ;;  %v241_v5 = vpack.c.bf16 %v1589_v2, %v1585_v0  ;;  %v1535_v6 = vmov 0   ;;  %vm291_vm0 = vcmask 130048   ;;  %v1374_v7 = vld [vmem:[%s1958_s1] sm:$0xff]   ;;  %v249_v9 = vld [vmem:[%s1959_s2 + $0x8] sm:$0xff] }
  0x14   : > { %333 = vmatprep.mubr.bf16.mxu0 %v1535_v6  ;;  %1372 = vset.pattern.permute.xlu0 %v1535_v6  ;;  %v248_v8 = vld [vmem:[%s1959_s2] sm:$0xff]  ;;  %vm542_vm1 = vcmask 1043456   ;;  %vm493_vm2 = vcmask 64512   ;;  %s1147_s20 = sld [smem:[#allocation5]] }
  0x15   : > { %315 = vmatprep.subr.bf16.mxu0 %v242_v4  ;;  %581 = vmatprep.mubr.bf16.mxu1 %v1535_v6 }
  0x16   : > { %316 = vmatpush1.bf16.msra.mxu0 %v241_v5  ;;  %255 = vperm.xlu0 %1372, %v248_v8  }
  0x19   : > { %1267 = vmatmul.mubr.msk.bf16.vlgmr.msra.gmra.mxu0 %vm291_vm0, %v1374_v7 }
  0x1a   : > { %343 = vmatprep.mubr.bf16.mxu0 %v1535_v6  ;;  %260 = vperm.xlu0 %1372, %v249_v9  }
  0x91   : > { %v256_v10 = vpop.permute.xlu0 %255 }
  0x95   : > { %v261_v15 = vpop.permute.xlu0 %260 }
  0xd9   : > { %v335_v11 = vpop.f32.mrf.mxu0 }
  0xda   : > { %v336_v13 = vadd.f32 %v335_v11, %v256_v10 }
  0xdb   : > { %v337_v12 = vpop.f32.mrf.mxu0 }
  0xdc   : > { %v338_v14 = vadd.f32 %v337_v12, %v256_v10 }
  0xdd   : > { %v339_v16 = vpop.f32.mrf.mxu0 }
  0xde   : > { %v340_v17 = vadd.f32 %v339_v16, %v261_v15  ;;  %v1303_v18 = vpack.c.bf16 %v338_v14, %v336_v13 }
  0xdf   : > { %v341_v19 = vpop.f32.mrf.mxu0 }
  0xe0   : > { %v1308_v20 = vpack.c.bf16 %v340_v17, %v340_v17  ;;  %v342_v21 = vadd.f32 %v341_v19, %v261_v15  ;;  %v406_v22 = vunpack.c.l.bf16 %v1303_v18  ;;  %v407_v25 = vunpack.c.h.bf16 %v1303_v18  ;;  %v1375_v15 = vld [vmem:[%s1958_s1 + $0x8] sm:$0xff]   ;;  %v1376_v19 = vld [vmem:[%s1958_s1 + $0x10] ss:$0 sps:$4 sm:$0xff]  }
  0xe1   : > { %1268 = vmatmul.mubr.msk.bf16.gmra.mxu0 %vm291_vm0, %v1375_v15 }
  0xe2   : > { %v1309_v23 = vpack.c.bf16 %v342_v21, %v342_v21  ;;  %408 = vxpose.xlu1.b32.start.end [1/1] (short) %v406_v22, 128  ;;  %v544_v24 = vsel %vm542_vm1, %v1308_v20, 0  ;;  %353 = vmatprep.mubr.bf16.mxu0 %v1535_v6 }
  0xe4   : > { %1277 = vmatprep.subr.msk.bf16.mxu1 %vm542_vm1, %v1309_v23 }
  0xe5   : > { %564 = vmatpush1.bf16.msra.mxu1 %v544_v24 }
  0xe9   : > { %1269 = vmatmul.mubr.msk.bf16.gmra.mxu0 %vm291_vm0, %v1376_v19 }
 0x11f   : > { %440 = vxpose.xlu1.b32.start.end [1/1] (short) %v407_v25, 128 }
 0x13d   : > { %1373 = vset.pattern.permute.xlu1 %v1535_v6 }
 0x15e   : > { %v424_v26 = vpop.trf.xlu1 }
 0x162   : > { %v425_v27 = vpop.trf.xlu1 }
 0x163   : > { %v472_v28 = vpack.c.bf16 %v425_v27, %v424_v26 }
 0x165   : > { %1278 = vmatmul.mubr.msk.bf16.vlgmr.msra.gmra.mxu1 %vm493_vm2, %v472_v28 }
 0x166   : > { %v426_v29 = vpop.trf.xlu1  ;;  %591 = vmatprep.mubr.bf16.mxu1 %v1535_v6 }
 0x16a   : > { %v427_v30 = vpop.trf.xlu1 }
 0x16b   : > { %v473_v31 = vpack.c.bf16 %v427_v30, %v426_v29 }
 0x16d   : > { %1279 = vmatmul.mubr.msk.bf16.gmra.mxu1 %vm493_vm2, %v473_v31 }
 0x16e   : > { %v428_v32 = vpop.trf.xlu1  ;;  %601 = vmatprep.mubr.bf16.mxu1 %v1535_v6 }
 0x172   : > { %v429_v33 = vpop.trf.xlu1 }
 0x173   : > { %v474_v34 = vpack.c.bf16 %v429_v33, %v428_v32 }
 0x175   : > { %1280 = vmatmul.mubr.msk.bf16.gmra.mxu1 %vm493_vm2, %v474_v34 }
 0x176   : > { %v430_v35 = vpop.trf.xlu1  ;;  %611 = vmatprep.mubr.bf16.mxu1 %v1535_v6 }
 0x17a   : > { %v431_v36 = vpop.trf.xlu1 }
 0x17b   : > { %v475_v37 = vpack.c.bf16 %v431_v36, %v430_v35 }
 0x17d   : > { %1281 = vmatmul.mubr.msk.bf16.gmra.mxu1 %vm493_vm2, %v475_v37 }
 0x17e   : > { %v432_v38 = vpop.trf.xlu1  ;;  %621 = vmatprep.mubr.bf16.mxu1 %v1535_v6 }
 0x182   : > { %v433_v39 = vpop.trf.xlu1 }
 0x183   : > { %v476_v40 = vpack.c.bf16 %v433_v39, %v432_v38 }
 0x185   : > { %1282 = vmatmul.mubr.msk.bf16.gmra.mxu1 %vm493_vm2, %v476_v40 }
 0x186   : > { %v434_v41 = vpop.trf.xlu1  ;;  %631 = vmatprep.mubr.bf16.mxu1 %v1535_v6 }
 0x18a   : > { %v435_v42 = vpop.trf.xlu1 }
 0x18b   : > { %v477_v43 = vpack.c.bf16 %v435_v42, %v434_v41 }
 0x18d   : > { %1283 = vmatmul.mubr.msk.bf16.gmra.mxu1 %vm493_vm2, %v477_v43 }
 0x18e   : > { %v436_v44 = vpop.trf.xlu1  ;;  %641 = vmatprep.mubr.bf16.mxu1 %v1535_v6 }
 0x192   : > { %v437_v45 = vpop.trf.xlu1 }
 0x193   : > { %v478_v46 = vpack.c.bf16 %v437_v45, %v436_v44 }
 0x195   : > { %1284 = vmatmul.mubr.msk.bf16.gmra.mxu1 %vm493_vm2, %v478_v46 }
 0x196   : > { %v438_v47 = vpop.trf.xlu1  ;;  %651 = vmatprep.mubr.bf16.mxu1 %v1535_v6 }
 0x19a   : > { %v439_v48 = vpop.trf.xlu1 }
 0x19b   : > { %v479_v49 = vpack.c.bf16 %v439_v48, %v438_v47 }
 0x19d   : > { %1285 = vmatmul.mubr.msk.bf16.gmra.mxu1 %vm493_vm2, %v479_v49 }
 0x19e   : > { %v456_v50 = vpop.trf.xlu1  ;;  %661 = vmatprep.mubr.bf16.mxu1 %v1535_v6 }
 0x1a2   : > { %v457_v51 = vpop.trf.xlu1 }
 0x1a3   : > { %v480_v52 = vpack.c.bf16 %v457_v51, %v456_v50 }
 0x1a5   : > { %1286 = vmatmul.mubr.msk.bf16.gmra.mxu1 %vm493_vm2, %v480_v52 }
 0x1a6   : > { %v458_v53 = vpop.trf.xlu1  ;;  %671 = vmatprep.mubr.bf16.mxu1 %v1535_v6 }
 0x1aa   : > { %v459_v54 = vpop.trf.xlu1 }
 0x1ab   : > { %v481_v55 = vpack.c.bf16 %v459_v54, %v458_v53 }
 0x1ad   : > { %1287 = vmatmul.mubr.msk.bf16.gmra.mxu1 %vm493_vm2, %v481_v55 }
 0x1ae   : > { %v460_v56 = vpop.trf.xlu1  ;;  %681 = vmatprep.mubr.bf16.mxu1 %v1535_v6 }
 0x1b2   : > { %v461_v57 = vpop.trf.xlu1 }
 0x1b3   : > { %v482_v58 = vpack.c.bf16 %v461_v57, %v460_v56 }
 0x1b5   : > { %1288 = vmatmul.mubr.msk.bf16.gmra.mxu1 %vm493_vm2, %v482_v58 }
 0x1b6   : > { %v462_v59 = vpop.trf.xlu1  ;;  %691 = vmatprep.mubr.bf16.mxu1 %v1535_v6 }
 0x1ba   : > { %v463_v60 = vpop.trf.xlu1 }
 0x1bb   : > { %v483_v61 = vpack.c.bf16 %v463_v60, %v462_v59 }
 0x1bd   : > { %1289 = vmatmul.mubr.msk.bf16.gmra.mxu1 %vm493_vm2, %v483_v61 }
 0x1be   : > { %v464_v62 = vpop.trf.xlu1  ;;  %701 = vmatprep.mubr.bf16.mxu1 %v1535_v6 }
 0x1c2   : > { %v465_v63 = vpop.trf.xlu1 }
 0x1c3   : > { %v484_v4 = vpack.c.bf16 %v465_v63, %v464_v62 }
 0x1c5   : > { %1290 = vmatmul.mubr.msk.bf16.gmra.mxu1 %vm493_vm2, %v484_v4 }
 0x1c6   : > { %v466_v5 = vpop.trf.xlu1  ;;  %711 = vmatprep.mubr.bf16.mxu1 %v1535_v6 }
 0x1ca   : > { %v467_v7 = vpop.trf.xlu1 }
 0x1cb   : > { %v485_v8 = vpack.c.bf16 %v467_v7, %v466_v5  ;;  %v250_v7 = vld [vmem:[%s1959_s2 + $0x10] sm:$0xff] }
 0x1cd   : > { %1291 = vmatmul.mubr.msk.bf16.gmra.mxu1 %vm493_vm2, %v485_v8 }
 0x1ce   : > { %v468_v9 = vpop.trf.xlu1  ;;  %721 = vmatprep.mubr.bf16.mxu1 %v1535_v6 }
 0x1d2   : > { %v469_v10 = vpop.trf.xlu1 }
 0x1d3   : > { %v486_v11 = vpack.c.bf16 %v469_v10, %v468_v9 }
 0x1d5   : > { %1292 = vmatmul.mubr.msk.bf16.gmra.mxu1 %vm493_vm2, %v486_v11 }
 0x1d6   : > { %v470_v12 = vpop.trf.xlu1  ;;  %731 = vmatprep.mubr.bf16.mxu1 %v1535_v6 }
 0x1da   : > { %v471_v13 = vpop.trf.xlu1 }
 0x1db   : > { %v487_v14 = vpack.c.bf16 %v471_v13, %v470_v12 }
 0x1dd   : > { %1293 = vmatmul.mubr.msk.bf16.gmra.mxu1 %vm493_vm2, %v487_v14 }
 0x225   : > { %v1651_v16 = vpop.f32.mrf.mxu1 }
 0x226   : > { %1983 = vst [vmem:[#allocation12_spill] sm:$0xff] %v1651_v16 }
 0x227   : > { %v1655_v17 = vpop.f32.mrf.mxu1 }
 0x228   : > { %1984 = vst [vmem:[#allocation13_spill] sm:$0xff] %v1655_v17 }
 0x229   : > { %v1657_v18 = vpop.f32.mrf.mxu1 }
 0x22a   : > { %1985 = vst [vmem:[#allocation14_spill] sm:$0xff] %v1657_v18 }
 0x22b   : > { %v1662_v20 = vpop.f32.mrf.mxu1 }
 0x22c   : > { %1986 = vst [vmem:[#allocation15_spill] sm:$0xff] %v1662_v20 }
 0x22d   : > { %v1664_v21 = vpop.f32.mrf.mxu1 }
 0x22f   : > { %v1667_v22 = vpop.f32.mrf.mxu1 }
 0x231   : > { %v1669_v23 = vpop.f32.mrf.mxu1 }
 0x233   : > { %v1671_v24 = vpop.f32.mrf.mxu1 }
 0x235   : > { %v1673_v6 = vpop.f32.mrf.mxu1 }
 0x237   : > { %v1675_v25 = vpop.f32.mrf.mxu1 }
 0x238   : > { %v754_v19 = vmax.f32 %v1673_v6, %v1675_v25 }
 0x239   : > { %v1677_v26 = vpop.f32.mrf.mxu1 }
 0x23b   : > { %v1679_v27 = vpop.f32.mrf.mxu1 }
 0x23d   : > { %v1681_v28 = vpop.f32.mrf.mxu1 }
 0x23f   : > { %v1683_v29 = vpop.f32.mrf.mxu1 }
 0x240   : > { %v760_v30 = vmax.f32 %v1681_v28, %v1683_v29 }
 0x241   : > { %v1687_v31 = vpop.f32.mrf.mxu1 }
 0x242   : > { %761 = vmax.xlane.f32.xlu1 %v760_v30 }
 0x243   : > { %v1689_v32 = vpop.f32.mrf.mxu1 }
 0x244   : > { %v763_v13 = vmax.f32 %v1687_v31, %v1689_v32 }
 0x245   : > { %v1691_v33 = vpop.f32.mrf.mxu1 }
 0x247   : > { %v1693_v34 = vpop.f32.mrf.mxu1 }
 0x248   : > { %v766_v5 = vmax.f32 %v1691_v33, %v1693_v34 }
 0x249   : > { %v1695_v35 = vpop.f32.mrf.mxu1 }
 0x24b   : > { %v1697_v36 = vpop.f32.mrf.mxu1 }
 0x24c   : > { %v769_v10 = vmax.f32 %v1695_v35, %v1697_v36 }
 0x24d   : > { %v1699_v37 = vpop.f32.mrf.mxu1 }
 0x24f   : > { %v1701_v38 = vpop.f32.mrf.mxu1 }
 0x250   : > { %v772_v59 = vmax.f32 %v1699_v37, %v1701_v38 }
 0x251   : > { %v1703_v39 = vpop.f32.mrf.mxu1 }
 0x253   : > { %v1705_v40 = vpop.f32.mrf.mxu1  ;;  %265 = vperm.xlu1 %1373, %v250_v7   ;;  %v751_v7 = vmax.f32 %v1669_v23, %v1671_v24 }
 0x254   : > { %v775_v62 = vmax.f32 %v1703_v39, %v1705_v40 }
 0x255   : > { %v1707_v41 = vpop.f32.mrf.mxu1 }
 0x257   : > { %v1709_v42 = vpop.f32.mrf.mxu1 }
 0x258   : > { %v778_v53 = vmax.f32 %v1707_v41, %v1709_v42 }
 0x259   : > { %v1711_v43 = vpop.f32.mrf.mxu1 }
 0x25b   : > { %v1713_v44 = vpop.f32.mrf.mxu1 }
 0x25c   : > { %v781_v56 = vmax.f32 %v1711_v43, %v1713_v44 }
 0x25d   : > { %v1715_v45 = vpop.f32.mrf.mxu1 }
 0x25f   : > { %v1717_v46 = vpop.f32.mrf.mxu1 }
 0x260   : > { %v784_v47 = vmax.f32 %v1715_v45, %v1717_v46 }
 0x261   : > { %v1721_v48 = vpop.f32.mrf.mxu1 }
 0x262   : > { %785 = vmax.xlane.f32.xlu0 %v784_v47 }
 0x263   : > { %v1723_v49 = vpop.f32.mrf.mxu1 }
 0x264   : > { %v787_v50 = vmax.f32 %v1721_v48, %v1723_v49 }
 0x265   : > { %v1727_v51 = vpop.f32.mrf.mxu1 }
 0x266   : > { %1987 = vst [vmem:[#allocation16_spill] sm:$0xff] %v1727_v51  ;;  %788 = vmax.xlane.f32.xlu0 %v787_v50  ;;  %v757_v50 = vmax.f32 %v1677_v26, %v1679_v27 }
 0x267   : > { %v1729_v52 = vpop.f32.mrf.mxu1 }
 0x268   : > { %1988 = vst [vmem:[#allocation17_spill] sm:$0xff] %v1729_v52 }
 0x269   : > { %v1733_v54 = vpop.f32.mrf.mxu1 }
 0x26a   : > { %779 = vmax.xlane.f32.xlu0 %v778_v53 }
 0x26b   : > { %v1735_v55 = vpop.f32.mrf.mxu1 }
 0x26c   : > { %1989 = vst [vmem:[#allocation18_spill] sm:$0xff] %v1735_v55 }
 0x26d   : > { %v1739_v57 = vpop.f32.mrf.mxu1 }
 0x26e   : > { %782 = vmax.xlane.f32.xlu0 %v781_v56 }
 0x26f   : > { %v1741_v58 = vpop.f32.mrf.mxu1 }
 0x270   : > { %1990 = vst [vmem:[#allocation19_spill] sm:$0xff] %v1741_v58 }
 0x271   : > { %v1745_v60 = vpop.f32.mrf.mxu1 }
 0x272   : > { %1991 = vst [vmem:[#allocation20_spill] sm:$0xff] %v1745_v60  ;;  %773 = vmax.xlane.f32.xlu0 %v772_v59  ;;  %v748_v59 = vmax.f32 %v1664_v21, %v1667_v22 }
 0x273   : > { %v1747_v61 = vpop.f32.mrf.mxu1 }
 0x274   : > { %1992 = vst [vmem:[#allocation21_spill] sm:$0xff] %v1747_v61 }
 0x275   : > { %v1751_v63 = vpop.f32.mrf.mxu1 }
 0x276   : > { %776 = vmax.xlane.f32.xlu0 %v775_v62 }
 0x277   : > { %v1753_v4 = vpop.f32.mrf.mxu1 }
 0x279   : > { %v1760_v8 = vpop.f32.mrf.mxu1 }
 0x27a   : > { %767 = vmax.xlane.f32.xlu0 %v766_v5 }
 0x27b   : > { %v1762_v9 = vpop.f32.mrf.mxu1 }
 0x27c   : > { %1993 = vst [vmem:[#allocation22_spill] sm:$0xff] %v1762_v9 }
 0x27d   : > { %v1766_v11 = vpop.f32.mrf.mxu1 }
 0x27e   : > { %770 = vmax.xlane.f32.xlu0 %v769_v10 }
 0x27f   : > { %v1768_v12 = vpop.f32.mrf.mxu1 }
 0x281   : > { %v1772_v14 = vpop.f32.mrf.mxu1 }
 0x282   : > { %764 = vmax.xlane.f32.xlu0 %v763_v13 }
 0x283   : > { %v1774_v15 = vpop.f32.mrf.mxu1 }
 0x285   : > { %v1778_v30 = vpop.f32.mrf.mxu1 }
 0x286   : > { %755 = vmax.xlane.f32.xlu0 %v754_v19  ;;  %v742_v19 = vmax.f32 %v1651_v16, %v1655_v17 }
 0x287   : > { %v1780_v47 = vpop.f32.mrf.mxu1 }
 0x289   : > { %v1784_v53 = vpop.f32.mrf.mxu1 }
 0x28a   : > { %758 = vmax.xlane.f32.xlu0 %v757_v50 }
 0x28b   : > { %v1786_v56 = vpop.f32.mrf.mxu1 }
 0x28d   : > { %v1790_v62 = vpop.f32.mrf.mxu1 }
 0x28e   : > { %749 = vmax.xlane.f32.xlu0 %v748_v59  ;;  %v745_v59 = vmax.f32 %v1657_v18, %v1662_v20 }
 0x28f   : > { %v1792_v5 = vpop.f32.mrf.mxu1 }
 0x291   : > { %v1796_v10 = vpop.f32.mrf.mxu1 }
 0x292   : > { %752 = vmax.xlane.f32.xlu0 %v751_v7 }
 0x293   : > { %v1798_v13 = vpop.f32.mrf.mxu1 }
 0x295   : > { %v1802_v50 = vpop.f32.mrf.mxu1 }
 0x296   : > { %743 = vmax.xlane.f32.xlu0 %v742_v19 }
 0x297   : > { %v1804_v3 = vpop.f32.mrf.mxu1 }
 0x299   : > { %v1808_v1 = vpop.f32.mrf.mxu1 }
 0x29a   : > { %746 = vmax.xlane.f32.xlu0 %v745_v59  ;;  %v826_v59 = vmax.f32 %v1802_v50, %v1804_v3 }
 0x29b   : > { %v1810_v2 = vpop.f32.mrf.mxu1 }
 0x29c   : > { %v829_v18 = vmax.f32 %v1808_v1, %v1810_v2 }
 0x29d   : > { %v1812_v0 = vpop.f32.mrf.mxu1 }
 0x29f   : > { %v1814_v7 = vpop.f32.mrf.mxu1 }
 0x2a0   : > { %1994 = vst [vmem:[#allocation23_spill] sm:$0xff] %v1814_v7  ;;  %v832_v16 = vmax.f32 %v1812_v0, %v1814_v7  ;;  %v820_v7 = vmax.f32 %v1790_v62, %v1792_v5 }
 0x2a1   : > { %v1818_v17 = vpop.f32.mrf.mxu1 }
 0x2a2   : > { %833 = vmax.xlane.f32.xlu0 %v832_v16  ;;  %v823_v16 = vmax.f32 %v1796_v10, %v1798_v13 }
 0x2a3   : > { %v1820_v19 = vpop.f32.mrf.mxu1 }
 0x2a4   : > { %1995 = vst [vmem:[#allocation24_spill] sm:$0xff] %v1820_v19  ;;  %v835_v20 = vmax.f32 %v1818_v17, %v1820_v19  ;;  %v814_v19 = vmax.f32 %v1778_v30, %v1780_v47 }
 0x2a6   : > { %836 = vmax.xlane.f32.xlu0 %v835_v20  ;;  %v817_v20 = vmax.f32 %v1784_v53, %v1786_v56 }
 0x2aa   : > { %827 = vmax.xlane.f32.xlu0 %v826_v59  ;;  %v808_v59 = vmax.f32 %v1766_v11, %v1768_v12 }
 0x2ae   : > { %830 = vmax.xlane.f32.xlu0 %v829_v18  ;;  %v811_v18 = vmax.f32 %v1772_v14, %v1774_v15 }
 0x2b2   : > { %821 = vmax.xlane.f32.xlu0 %v820_v7  ;;  %v802_v7 = vmax.f32 %v1751_v63, %v1753_v4 }
 0x2b6   : > { %824 = vmax.xlane.f32.xlu0 %v823_v16  ;;  %v805_v16 = vmax.f32 %v1760_v8, %v1762_v9 }
 0x2ba   : > { %815 = vmax.xlane.f32.xlu0 %v814_v19  ;;  %v796_v19 = vmax.f32 %v1739_v57, %v1741_v58 }
 0x2be   : > { %818 = vmax.xlane.f32.xlu0 %v817_v20  ;;  %v799_v20 = vmax.f32 %v1745_v60, %v1747_v61 }
 0x2c2   : > { %809 = vmax.xlane.f32.xlu0 %v808_v59  ;;  %v790_v59 = vmax.f32 %v1727_v51, %v1729_v52 }
 0x2c6   : > { %812 = vmax.xlane.f32.xlu0 %v811_v18  ;;  %v793_v18 = vmax.f32 %v1733_v54, %v1735_v55 }
 0x2ca   : > { %803 = vmax.xlane.f32.xlu0 %v802_v7  ;;  %v1852_v7 = vpop.f32.mrf.mxu0 }
 0x2cb   : > { %1996 = vst [vmem:[#allocation25_spill] sm:$0xff] %v1852_v7 }
 0x2cc   : > { %v1854_v9 = vpop.f32.mrf.mxu0 }
 0x2ce   : > { %806 = vmax.xlane.f32.xlu0 %v805_v16  ;;  %v1856_v16 = vpop.f32.mrf.mxu0 }
 0x2cf   : > { %1997 = vst [vmem:[#allocation26_spill] sm:$0xff] %v1856_v16  ;;  %v252_v16 = vld [vmem:[%s1959_s2 + $0x20] sm:$0xff] }
 0x2d2   : > { %797 = vmax.xlane.f32.xlu0 %v796_v19 }
 0x2d6   : > { %800 = vmax.xlane.f32.xlu0 %v799_v20  ;;  %v1860_v20 = vpop.f32.mrf.mxu0 }
 0x2d7   : > { %1998 = vst [vmem:[#allocation27_spill] sm:$0xff] %v1860_v20 }
 0x2d8   : > { %v1862_v52 = vpop.f32.mrf.mxu0 }
 0x2d9   : > { %1999 = vst [vmem:[#allocation28_spill] sm:$0xff] %v1862_v52 }
 0x2da   : > { %791 = vmax.xlane.f32.xlu0 %v790_v59  ;;  %v1866_v55 = vpop.f32.mrf.mxu0 }
 0x2de   : > { %794 = vmax.xlane.f32.xlu0 %v793_v18 }
 0x2eb   : > { %v786_v58 = vpop.xlane.xlu0 %785 }
 0x2ec   : > { %v866_v19 = vsub.f32 %v1715_v45, %v786_v58  ;;  %v867_v61 = vsub.f32 %v1717_v46, %v786_v58  ;;  %v359_v58 = vpop.f32.mrf.mxu0 }
 0x2ee   : > { %v958_v60 = vmul.f32 1.442695, %v866_v19  ;;  %v960_v59 = vmul.f32 1.442695, %v867_v61 }
 0x2ef   : > { %v789_v51 = vpop.xlane.xlu0 %788 }
 0x2f0   : > { %v868_v18 = vsub.f32 %v1721_v48, %v789_v51  ;;  %v869_v7 = vsub.f32 %v1723_v49, %v789_v51  ;;  %1377 = vpow2.f32 %v958_v60  ;;  %v360_v48 = vpop.f32.mrf.mxu0  ;;  %v251_v49 = vld [vmem:[%s1959_s2 + $0x18] sm:$0xff] }
 0x2f1   : > { %1379 = vpow2.f32 %v960_v59 }
 0x2f2   : > { %v962_v45 = vmul.f32 1.442695, %v868_v18  ;;  %v964_v46 = vmul.f32 1.442695, %v869_v7 }
 0x2f3   : > { %v780_v19 = vpop.xlane.xlu0 %779 }
 0x2f4   : > { %1381 = vpow2.f32 %v962_v45  ;;  %v862_v61 = vsub.f32 %v1707_v41, %v780_v19  ;;  %v863_v52 = vsub.f32 %v1709_v42, %v780_v19  ;;  %275 = vperm.xlu0 %1372, %v252_v16  }
 0x2f5   : > { %1383 = vpow2.f32 %v964_v46 }
 0x2f6   : > { %v950_v51 = vmul.f32 1.442695, %v862_v61  ;;  %v952_v20 = vmul.f32 1.442695, %v863_v52 }
 0x2f7   : > { %v783_v60 = vpop.xlane.xlu0 %782 }
 0x2f8   : > { %v864_v7 = vsub.f32 %v1711_v43, %v783_v60  ;;  %v865_v59 = vsub.f32 %v1713_v44, %v783_v60  ;;  %270 = vperm.xlu0 %1372, %v251_v49   ;;  %1385 = vpow2.f32 %v950_v51 }
 0x2f9   : > { %1387 = vpow2.f32 %v952_v20 }
 0x2fa   : > { %v954_v18 = vmul.f32 1.442695, %v864_v7  ;;  %v956_v41 = vmul.f32 1.442695, %v865_v59 }
 0x2fb   : > { %v774_v42 = vpop.xlane.xlu0 %773 }
 0x2fc   : > { %1389 = vpow2.f32 %v954_v18  ;;  %v858_v16 = vsub.f32 %v1699_v37, %v774_v42  ;;  %v859_v45 = vsub.f32 %v1701_v38, %v774_v42  ;;  %v762_v18 = vpop.xlane.xlu1 %761 }
 0x2fd   : > { %1391 = vpow2.f32 %v956_v41  ;;  %v1378_v58 = vpop.eup %1377 }
 0x2fe   : > { %v942_v46 = vmul.f32 1.442695, %v858_v16  ;;  %v944_v52 = vmul.f32 1.442695, %v859_v45  ;;  %v1380_v61 = vpop.eup %1379  ;;  %v851_v45 = vsub.f32 %v1683_v29, %v762_v18  ;;  %v850_v29 = vsub.f32 %v1681_v28, %v762_v18 }
 0x2ff   : > { %v777_v19 = vpop.xlane.xlu0 %776 }
 0x300   : > { %v860_v43 = vsub.f32 %v1703_v39, %v777_v19  ;;  %v861_v44 = vsub.f32 %v1705_v40, %v777_v19  ;;  %1393 = vpow2.f32 %v942_v46 }
 0x301   : > { %v1382_v48 = vpop.eup %1381  ;;  %1395 = vpow2.f32 %v944_v52 }
 0x302   : > { %v1384_v49 = vpop.eup %1383  ;;  %v946_v20 = vmul.f32 1.442695, %v860_v43  ;;  %v948_v51 = vmul.f32 1.442695, %v861_v44  ;;  %v1044_v60 = vpack.c.bf16 %v1382_v48, %v1378_v58  ;;  %v928_v48 = vmul.f32 1.442695, %v851_v45 }
 0x303   : > { %v768_v37 = vpop.xlane.xlu0 %767  ;;  %v1045_v7 = vpack.c.bf16 %v1384_v49, %v1380_v61 }
 0x304   : > { %1397 = vpow2.f32 %v946_v20  ;;  %v854_v38 = vsub.f32 %v1691_v33, %v768_v37  ;;  %v855_v59 = vsub.f32 %v1693_v34, %v768_v37 }
 0x305   : > { %1399 = vpow2.f32 %v948_v51  ;;  %1082 = vmatprep.subr.bf16.mxu0 %v1045_v7  ;;  %1314 = vmatprep.subr.bf16.mxu1 %v1045_v7  ;;  %v1386_v40 = vpop.eup %1385 }
 0x306   : > { %v934_v39 = vmul.f32 1.442695, %v854_v38  ;;  %1083 = vmatpush1.bf16.xpose.msra.mxu0 %v1044_v60  ;;  %1330 = vmatpush1.bf16.xpose.msra.mxu1 %v1044_v60  ;;  %v936_v41 = vmul.f32 1.442695, %v855_v59  ;;  %v1388_v16 = vpop.eup %1387  ;;  %v926_v59 = vmul.f32 1.442695, %v850_v29 }
 0x307   : > { %v771_v42 = vpop.xlane.xlu0 %770 }
 0x308   : > { %v856_v46 = vsub.f32 %v1695_v35, %v771_v42  ;;  %v857_v58 = vsub.f32 %v1697_v36, %v771_v42  ;;  %1401 = vpow2.f32 %v934_v39 }
 0x309   : > { %v1390_v33 = vpop.eup %1389  ;;  %1403 = vpow2.f32 %v936_v41 }
 0x30a   : > { %v1392_v52 = vpop.eup %1391  ;;  %v938_v34 = vmul.f32 1.442695, %v856_v46  ;;  %v940_v19 = vmul.f32 1.442695, %v857_v58  ;;  %v1042_v61 = vpack.c.bf16 %v1390_v33, %v1386_v40 }
 0x30b   : > { %v765_v43 = vpop.xlane.xlu0 %764  ;;  %v1043_v44 = vpack.c.bf16 %v1392_v52, %v1388_v16 }
 0x30c   : > { %1405 = vpow2.f32 %v938_v34  ;;  %v852_v49 = vsub.f32 %v1687_v31, %v765_v43  ;;  %v853_v20 = vsub.f32 %v1689_v32, %v765_v43 }
 0x30d   : > { %1407 = vpow2.f32 %v940_v19  ;;  %1084 = vmatprep.subr.bf16.mxu0 %v1043_v44  ;;  %1315 = vmatprep.subr.bf16.mxu1 %v1043_v44  ;;  %v1394_v36 = vpop.eup %1393 }
 0x30e   : > { %v932_v35 = vmul.f32 1.442695, %v853_v20  ;;  %1085 = vmatpush1.bf16.xpose.msra.mxu0 %v1042_v61  ;;  %1331 = vmatpush1.bf16.xpose.msra.mxu1 %v1042_v61  ;;  %v930_v51 = vmul.f32 1.442695, %v852_v49  ;;  %v1396_v37 = vpop.eup %1395  ;;  %1409 = vpow2.f32 %v928_v48 }
 0x30f   : > { %v756_v60 = vpop.xlane.xlu0 %755 }
 0x310   : > { %v847_v7 = vsub.f32 %v1675_v25, %v756_v60  ;;  %1411 = vpow2.f32 %v932_v35  ;;  %v846_v42 = vsub.f32 %v1673_v6, %v756_v60  ;;  %v2000_v60 = vld [vmem:[#allocation13_spill] sm:$0xff] }
 0x311   : > { %v1398_v38 = vpop.eup %1397  ;;  %1413 = vpow2.f32 %v930_v51 }
 0x312   : > { %v1400_v31 = vpop.eup %1399  ;;  %v1040_v32 = vpack.c.bf16 %v1398_v38, %v1394_v36  ;;  %v920_v39 = vmul.f32 1.442695, %v847_v7  ;;  %1415 = vpow2.f32 %v926_v59  ;;  %v918_v34 = vmul.f32 1.442695, %v846_v42 }
 0x313   : > { %v759_v28 = vpop.xlane.xlu0 %758  ;;  %v1041_v18 = vpack.c.bf16 %v1400_v31, %v1396_v37 }
 0x314   : > { %v848_v40 = vsub.f32 %v1677_v26, %v759_v28  ;;  %v849_v41 = vsub.f32 %v1679_v27, %v759_v28  ;;  %1417 = vpow2.f32 %v920_v39 }
 0x315   : > { %1086 = vmatprep.subr.bf16.mxu0 %v1041_v18  ;;  %1316 = vmatprep.subr.bf16.mxu1 %v1041_v18  ;;  %v1402_v25 = vpop.eup %1401 }
 0x316   : > { %v924_v16 = vmul.f32 1.442695, %v849_v41  ;;  %1087 = vmatpush1.bf16.xpose.msra.mxu0 %v1040_v32  ;;  %1332 = vmatpush1.bf16.xpose.msra.mxu1 %v1040_v32  ;;  %v1404_v46 = vpop.eup %1403  ;;  %v922_v58 = vmul.f32 1.442695, %v848_v40  ;;  %v2002_v32 = vld [vmem:[#allocation15_spill] sm:$0xff]  ;;  %v2003_v40 = vld [vmem:[#allocation12_spill] sm:$0xff] }
 0x317   : > { %v750_v45 = vpop.xlane.xlu0 %749 }
 0x318   : > { %v843_v33 = vsub.f32 %v1667_v22, %v750_v45  ;;  %1419 = vpow2.f32 %v924_v16  ;;  %v842_v22 = vsub.f32 %v1664_v21, %v750_v45  ;;  %v2001_v21 = vld [vmem:[#allocation14_spill] sm:$0xff] }
 0x319   : > { %v1406_v52 = vpop.eup %1405  ;;  %1421 = vpow2.f32 %v922_v58 }
 0x31a   : > { %v1408_v26 = vpop.eup %1407  ;;  %v1038_v27 = vpack.c.bf16 %v1406_v52, %v1402_v25  ;;  %v912_v43 = vmul.f32 1.442695, %v843_v33  ;;  %1423 = vpow2.f32 %v918_v34 }
 0x31b   : > { %v753_v19 = vpop.xlane.xlu0 %752  ;;  %v1039_v61 = vpack.c.bf16 %v1408_v26, %v1404_v46  ;;  %v1410_v48 = vpop.eup %1409  ;;  %v2004_v26 = vld [vmem:[#allocation23_spill] sm:$0xff] }
 0x31c   : > { %v844_v6 = vsub.f32 %v1669_v23, %v753_v19  ;;  %v845_v44 = vsub.f32 %v1671_v24, %v753_v19  ;;  %1425 = vpow2.f32 %v912_v43  ;;  %v910_v24 = vmul.f32 1.442695, %v842_v22  ;;  %v2005_v22 = vld [vmem:[#allocation24_spill] sm:$0xff] }
 0x31d   : > { %1088 = vmatprep.subr.bf16.mxu0 %v1039_v61  ;;  %1317 = vmatprep.subr.bf16.mxu1 %v1039_v61  ;;  %v1412_v49 = vpop.eup %1411 }
 0x31e   : > { %v916_v20 = vmul.f32 1.442695, %v845_v44  ;;  %1089 = vmatpush1.bf16.xpose.msra.mxu0 %v1038_v27  ;;  %1333 = vmatpush1.bf16.xpose.msra.mxu1 %v1038_v27  ;;  %v1037_v35 = vpack.c.bf16 %v1412_v49, %v1410_v48  ;;  %v1414_v36 = vpop.eup %1413  ;;  %v914_v51 = vmul.f32 1.442695, %v844_v6 }
 0x31f   : > { %v744_v29 = vpop.xlane.xlu0 %743  ;;  %v1416_v23 = vpop.eup %1415 }
 0x320   : > { %v839_v37 = vsub.f32 %v2000_v60, %v744_v29  ;;  %1427 = vpow2.f32 %v916_v20  ;;  %1090 = vmatprep.subr.bf16.mxu0 %v1037_v35  ;;  %1318 = vmatprep.subr.bf16.mxu1 %v1037_v35  ;;  %v1036_v38 = vpack.c.bf16 %v1414_v36, %v1416_v23  ;;  %v838_v41 = vsub.f32 %v2003_v40, %v744_v29 }
 0x321   : > { %1429 = vpow2.f32 %v914_v51  ;;  %v1418_v18 = vpop.eup %1417 }
 0x322   : > { %v904_v59 = vmul.f32 1.442695, %v839_v37  ;;  %1431 = vpow2.f32 %v910_v24  ;;  %v902_v46 = vmul.f32 1.442695, %v838_v41 }
 0x323   : > { %v747_v7 = vpop.xlane.xlu0 %746 }
 0x324   : > { %v840_v31 = vsub.f32 %v2001_v21, %v747_v7  ;;  %v841_v28 = vsub.f32 %v2002_v32, %v747_v7  ;;  %1433 = vpow2.f32 %v904_v59 }
 0x325   : > { %v1420_v39 = vpop.eup %1419 }
 0x326   : > { %v908_v42 = vmul.f32 1.442695, %v841_v28  ;;  %1091 = vmatpush1.bf16.xpose.msra.mxu0 %v1036_v38  ;;  %1334 = vmatpush1.bf16.xpose.msra.mxu1 %v1036_v38  ;;  %v1035_v16 = vpack.c.bf16 %v1420_v39, %v1418_v18  ;;  %v906_v25 = vmul.f32 1.442695, %v840_v31  ;;  %v1422_v45 = vpop.eup %1421 }
 0x327   : > { %v1424_v58 = vpop.eup %1423 }
 0x328   : > { %1435 = vpow2.f32 %v908_v42  ;;  %1092 = vmatprep.subr.bf16.mxu0 %v1035_v16  ;;  %1319 = vmatprep.subr.bf16.mxu1 %v1035_v16  ;;  %v1034_v27 = vpack.c.bf16 %v1422_v45, %v1424_v58 }
 0x329   : > { %1437 = vpow2.f32 %v906_v25  ;;  %v1426_v19 = vpop.eup %1425 }
 0x32a   : > { %1439 = vpow2.f32 %v902_v46 }
 0x32b   : > { %v834_v33 = vpop.xlane.xlu0 %833 }
 0x32c   : > { %v898_v52 = vsub.f32 %v1812_v0, %v834_v33  ;;  %v899_v34 = vsub.f32 %v2004_v26, %v834_v33 }
 0x32d   : > { %v1428_v61 = vpop.eup %1427 }
 0x32e   : > { %v1022_v43 = vmul.f32 1.442695, %v898_v52  ;;  %1093 = vmatpush1.bf16.xpose.msra.mxu0 %v1034_v27  ;;  %1335 = vmatpush1.bf16.xpose.msra.mxu1 %v1034_v27  ;;  %v1024_v6 = vmul.f32 1.442695, %v899_v34  ;;  %v1033_v48 = vpack.c.bf16 %v1428_v61, %v1426_v19  ;;  %v1430_v29 = vpop.eup %1429 }
 0x32f   : > { %v837_v44 = vpop.xlane.xlu0 %836  ;;  %v1432_v36 = vpop.eup %1431 }
 0x330   : > { %v900_v49 = vsub.f32 %v1818_v17, %v837_v44  ;;  %v901_v20 = vsub.f32 %v2005_v22, %v837_v44  ;;  %1094 = vmatprep.subr.bf16.mxu0 %v1033_v48  ;;  %1320 = vmatprep.subr.bf16.mxu1 %v1033_v48  ;;  %1441 = vpow2.f32 %v1022_v43  ;;  %v1032_v23 = vpack.c.bf16 %v1430_v29, %v1432_v36 }
 0x331   : > { %1443 = vpow2.f32 %v1024_v6  ;;  %v1434_v24 = vpop.eup %1433 }
 0x332   : > { %v1026_v0 = vmul.f32 1.442695, %v900_v49  ;;  %v1028_v35 = vmul.f32 1.442695, %v901_v20 }
 0x333   : > { %v828_v51 = vpop.xlane.xlu0 %827 }
 0x334   : > { %1445 = vpow2.f32 %v1026_v0  ;;  %v894_v60 = vsub.f32 %v1802_v50, %v828_v51  ;;  %v895_v37 = vsub.f32 %v1804_v3, %v828_v51 }
 0x335   : > { %1447 = vpow2.f32 %v1028_v35  ;;  %v1436_v17 = vpop.eup %1435 }
 0x336   : > { %v1014_v7 = vmul.f32 1.442695, %v894_v60  ;;  %1095 = vmatpush1.bf16.xpose.msra.mxu0 %v1032_v23  ;;  %1336 = vmatpush1.bf16.xpose.msra.mxu1 %v1032_v23  ;;  %v1016_v38 = vmul.f32 1.442695, %v895_v37  ;;  %v1031_v21 = vpack.c.bf16 %v1436_v17, %v1434_v24  ;;  %v1438_v28 = vpop.eup %1437 }
 0x337   : > { %v831_v59 = vpop.xlane.xlu0 %830  ;;  %v1440_v18 = vpop.eup %1439 }
 0x338   : > { %v896_v31 = vsub.f32 %v1808_v1, %v831_v59  ;;  %v897_v32 = vsub.f32 %v1810_v2, %v831_v59  ;;  %1096 = vmatprep.subr.bf16.mxu0 %v1031_v21  ;;  %1321 = vmatprep.subr.bf16.mxu1 %v1031_v21  ;;  %1449 = vpow2.f32 %v1014_v7  ;;  %v1030_v42 = vpack.c.bf16 %v1438_v28, %v1440_v18 }
 0x339   : > { %1451 = vpow2.f32 %v1016_v38 }
 0x33a   : > { %v1018_v50 = vmul.f32 1.442695, %v896_v31  ;;  %v1020_v3 = vmul.f32 1.442695, %v897_v32 }
 0x33b   : > { %v822_v39 = vpop.xlane.xlu0 %821 }
 0x33c   : > { %1453 = vpow2.f32 %v1018_v50  ;;  %v890_v40 = vsub.f32 %v1790_v62, %v822_v39  ;;  %v891_v41 = vsub.f32 %v1792_v5, %v822_v39 }
 0x33d   : > { %1455 = vpow2.f32 %v1020_v3  ;;  %v1442_v1 = vpop.eup %1441 }
 0x33e   : > { %v1006_v16 = vmul.f32 1.442695, %v890_v40  ;;  %1097 = vmatpush1.bf16.xpose.msra.mxu0 %v1030_v42  ;;  %1337 = vmatpush1.bf16.xpose.msra.mxu1 %v1030_v42  ;;  %v1008_v2 = vmul.f32 1.442695, %v891_v41  ;;  %v1444_v45 = vpop.eup %1443  ;;  %v2006_v40 = vld [vmem:[#allocation22_spill] sm:$0xff] }
 0x33f   : > { %v825_v25 = vpop.xlane.xlu0 %824 }
 0x340   : > { %v892_v46 = vsub.f32 %v1796_v10, %v825_v25  ;;  %v893_v58 = vsub.f32 %v1798_v13, %v825_v25  ;;  %1457 = vpow2.f32 %v1006_v16 }
 0x341   : > { %v1446_v33 = vpop.eup %1445  ;;  %1459 = vpow2.f32 %v1008_v2 }
 0x342   : > { %v1448_v52 = vpop.eup %1447  ;;  %v1010_v26 = vmul.f32 1.442695, %v892_v46  ;;  %v1012_v62 = vmul.f32 1.442695, %v893_v58  ;;  %v1060_v34 = vpack.c.bf16 %v1446_v33, %v1442_v1  ;;  %v2007_v46 = vld [vmem:[#allocation19_spill] sm:$0xff] }
 0x343   : > { %v816_v5 = vpop.xlane.xlu0 %815  ;;  %v1061_v27 = vpack.c.bf16 %v1448_v52, %v1444_v45 }
 0x344   : > { %1461 = vpow2.f32 %v1010_v26  ;;  %v886_v19 = vsub.f32 %v1778_v30, %v816_v5  ;;  %v887_v61 = vsub.f32 %v1780_v47, %v816_v5 }
 0x345   : > { %1463 = vpow2.f32 %v1012_v62  ;;  %1098 = vmatprep.subr.bf16.mxu0 %v1061_v27  ;;  %1322 = vmatprep.subr.bf16.mxu1 %v1061_v27  ;;  %v1450_v13 = vpop.eup %1449  ;;  %v2009_v27 = vld [vmem:[#allocation21_spill] sm:$0xff] }
 0x346   : > { %v998_v10 = vmul.f32 1.442695, %v886_v19  ;;  %1099 = vmatpush2.bf16.xpose.msra.mxu0 %v1060_v34  ;;  %1338 = vmatpush2.bf16.xpose.msra.mxu1 %v1060_v34  ;;  %v1000_v43 = vmul.f32 1.442695, %v887_v61  ;;  %v1452_v44 = vpop.eup %1451  ;;  %v2008_v34 = vld [vmem:[#allocation20_spill] sm:$0xff] }
 0x347   : > { %v819_v6 = vpop.xlane.xlu0 %818 }
 0x348   : > { %v888_v48 = vsub.f32 %v1784_v53, %v819_v6  ;;  %v889_v49 = vsub.f32 %v1786_v56, %v819_v6  ;;  %1465 = vpow2.f32 %v998_v10 }
 0x349   : > { %v1454_v22 = vpop.eup %1453  ;;  %1467 = vpow2.f32 %v1000_v43 }
 0x34a   : > { %v1456_v20 = vpop.eup %1455  ;;  %v1002_v30 = vmul.f32 1.442695, %v888_v48  ;;  %v1004_v29 = vmul.f32 1.442695, %v889_v49  ;;  %v1058_v47 = vpack.c.bf16 %v1454_v22, %v1450_v13  ;;  %v2010_v48 = vld [vmem:[#allocation16_spill] sm:$0xff]  ;;  %v2011_v22 = vld [vmem:[#allocation17_spill] sm:$0xff] }
 0x34b   : > { %v810_v0 = vpop.xlane.xlu0 %809  ;;  %v1059_v35 = vpack.c.bf16 %v1456_v20, %v1452_v44 }
 0x34c   : > { %1469 = vpow2.f32 %v1002_v30  ;;  %v882_v36 = vsub.f32 %v1766_v11, %v810_v0  ;;  %v883_v51 = vsub.f32 %v1768_v12, %v810_v0 }
 0x34d   : > { %1471 = vpow2.f32 %v1004_v29  ;;  %1100 = vmatprep.subr.bf16.mxu0 %v1059_v35  ;;  %1323 = vmatprep.subr.bf16.mxu1 %v1059_v35  ;;  %v1458_v56 = vpop.eup %1457 }
 0x34e   : > { %v990_v53 = vmul.f32 1.442695, %v882_v36  ;;  %1101 = vmatpush2.bf16.xpose.msra.mxu0 %v1058_v47  ;;  %1339 = vmatpush2.bf16.xpose.msra.mxu1 %v1058_v47  ;;  %v992_v60 = vmul.f32 1.442695, %v883_v51  ;;  %v1460_v23 = vpop.eup %1459  ;;  %v2012_v51 = vld [vmem:[#allocation18_spill] sm:$0xff] }
 0x34f   : > { %v813_v37 = vpop.xlane.xlu0 %812 }
 0x350   : > { %v884_v24 = vsub.f32 %v1772_v14, %v813_v37  ;;  %v885_v17 = vsub.f32 %v1774_v15, %v813_v37  ;;  %1473 = vpow2.f32 %v990_v53 }
 0x351   : > { %v1462_v7 = vpop.eup %1461  ;;  %1475 = vpow2.f32 %v992_v60 }
 0x352   : > { %v1464_v38 = vpop.eup %1463  ;;  %v994_v11 = vmul.f32 1.442695, %v884_v24  ;;  %v996_v59 = vmul.f32 1.442695, %v885_v17  ;;  %v1056_v12 = vpack.c.bf16 %v1462_v7, %v1458_v56 }
 0x353   : > { %v804_v21 = vpop.xlane.xlu0 %803  ;;  %v1057_v31 = vpack.c.bf16 %v1464_v38, %v1460_v23 }
 0x354   : > { %1477 = vpow2.f32 %v994_v11  ;;  %v878_v32 = vsub.f32 %v1751_v63, %v804_v21  ;;  %v879_v28 = vsub.f32 %v1753_v4, %v804_v21  ;;  %v266_v11 = vpop.permute.xlu1 %265 }
 0x355   : > { %1479 = vpow2.f32 %v996_v59  ;;  %1102 = vmatprep.subr.bf16.mxu0 %v1057_v31  ;;  %1324 = vmatprep.subr.bf16.mxu1 %v1057_v31  ;;  %v1466_v15 = vpop.eup %1465 }
 0x356   : > { %v982_v14 = vmul.f32 1.442695, %v878_v32  ;;  %1103 = vmatpush2.bf16.xpose.msra.mxu0 %v1056_v12  ;;  %1340 = vmatpush2.bf16.xpose.msra.mxu1 %v1056_v12  ;;  %v984_v50 = vmul.f32 1.442695, %v879_v28  ;;  %v1468_v18 = vpop.eup %1467  ;;  %v348_v32 = vadd.f32 %v1854_v9, %v266_v11  ;;  %v2014_v9 = vld [vmem:[#allocation28_spill] sm:$0xff] }
 0x357   : > { %v807_v3 = vpop.xlane.xlu0 %806 }
 0x358   : > { %v880_v39 = vsub.f32 %v1760_v8, %v807_v3  ;;  %v881_v41 = vsub.f32 %v2006_v40, %v807_v3  ;;  %1481 = vpow2.f32 %v982_v14 }
 0x359   : > { %v1470_v42 = vpop.eup %1469  ;;  %1483 = vpow2.f32 %v984_v50  ;;  %v2013_v50 = vld [vmem:[#allocation27_spill] sm:$0xff] }
 0x35a   : > { %v1472_v16 = vpop.eup %1471  ;;  %v986_v63 = vmul.f32 1.442695, %v880_v39  ;;  %v988_v1 = vmul.f32 1.442695, %v881_v41  ;;  %v1054_v4 = vpack.c.bf16 %v1470_v42, %v1466_v15 }
 0x35b   : > { %v798_v2 = vpop.xlane.xlu0 %797  ;;  %v1055_v25 = vpack.c.bf16 %v1472_v16, %v1468_v18 }
 0x35c   : > { %1485 = vpow2.f32 %v986_v63  ;;  %v874_v45 = vsub.f32 %v1739_v57, %v798_v2  ;;  %v875_v58 = vsub.f32 %v2007_v46, %v798_v2  ;;  %v2016_v2 = vld [vmem:[#allocation25_spill] sm:$0xff] }
 0x35d   : > { %1487 = vpow2.f32 %v988_v1  ;;  %1104 = vmatprep.subr.bf16.mxu0 %v1055_v25  ;;  %1325 = vmatprep.subr.bf16.mxu1 %v1055_v25  ;;  %v1474_v33 = vpop.eup %1473  ;;  %v2015_v1 = vld [vmem:[#allocation26_spill] sm:$0xff]  ;;  %v346_v25 = vadd.f32 %v2016_v2, %v266_v11 }
 0x35e   : > { %v974_v8 = vmul.f32 1.442695, %v874_v45  ;;  %1105 = vmatpush2.bf16.xpose.msra.mxu0 %v1054_v4  ;;  %1341 = vmatpush2.bf16.xpose.msra.mxu1 %v1054_v4  ;;  %v976_v52 = vmul.f32 1.442695, %v875_v58  ;;  %v1476_v62 = vpop.eup %1475 }
 0x35f   : > { %v801_v26 = vpop.xlane.xlu0 %800 }
 0x360   : > { %v876_v5 = vsub.f32 %v2008_v34, %v801_v26  ;;  %v877_v19 = vsub.f32 %v2009_v27, %v801_v26  ;;  %1489 = vpow2.f32 %v974_v8 }
 0x361   : > { %v1478_v61 = vpop.eup %1477  ;;  %1491 = vpow2.f32 %v976_v52 }
 0x362   : > { %v1480_v10 = vpop.eup %1479  ;;  %v978_v57 = vmul.f32 1.442695, %v876_v5  ;;  %v980_v13 = vmul.f32 1.442695, %v877_v19  ;;  %v1052_v43 = vpack.c.bf16 %v1478_v61, %v1474_v33  ;;  %v1135_v33 = vlaneseq }
 0x363   : > { %v792_v6 = vpop.xlane.xlu0 %791  ;;  %v1053_v44 = vpack.c.bf16 %v1480_v10, %v1476_v62 }
 0x364   : > { %1493 = vpow2.f32 %v978_v57  ;;  %v870_v49 = vsub.f32 %v2010_v48, %v792_v6  ;;  %v871_v20 = vsub.f32 %v2011_v22, %v792_v6  ;;  %v1136_v34 = vshrl.u32 %v1135_v33, 7 }
 0x365   : > { %1495 = vpow2.f32 %v980_v13  ;;  %1106 = vmatprep.subr.bf16.mxu0 %v1053_v44  ;;  %1326 = vmatprep.subr.bf16.mxu1 %v1053_v44  ;;  %v1482_v29 = vpop.eup %1481  ;;  %v1154_v13 = vstv %s1147_s20 }
 0x366   : > { %v966_v30 = vmul.f32 1.442695, %v870_v49  ;;  %1107 = vmatpush2.bf16.xpose.msra.mxu0 %v1052_v43  ;;  %1342 = vmatpush2.bf16.xpose.msra.mxu1 %v1052_v43  ;;  %v968_v47 = vmul.f32 1.442695, %v871_v20  ;;  %v1484_v35 = vpop.eup %1483  ;;  %v1137_v27 = vsub.s32 0, %v1136_v34 }
 0x367   : > { %v795_v0 = vpop.xlane.xlu0 %794 }
 0x368   : > { %v872_v36 = vsub.f32 %v1733_v54, %v795_v0  ;;  %v873_v53 = vsub.f32 %v2012_v51, %v795_v0  ;;  %1497 = vpow2.f32 %v966_v30  ;;  %v2018_v0 = vld [vmem:[#allocation10_spill] sm:$0xff] }
 0x369   : > { %v1486_v56 = vpop.eup %1485  ;;  %1499 = vpow2.f32 %v968_v47 }
 0x36a   : > { %v1488_v60 = vpop.eup %1487  ;;  %v970_v37 = vmul.f32 1.442695, %v872_v36  ;;  %v972_v23 = vmul.f32 1.442695, %v873_v53  ;;  %v1050_v24 = vpack.c.bf16 %v1486_v56, %v1482_v29  ;;  %v2017_v29 = vld [vmem:[#allocation8_spill] sm:$0xff]  ;;  %v2019_v53 = vld [vmem:[#allocation9_spill] sm:$0xff] }
 0x36b   : > { %v1051_v17 = vpack.c.bf16 %v1488_v60, %v1484_v35  ;;  %v2020_v60 = vld [vmem:[#allocation11_spill] sm:$0xff] }
 0x36c   : > { %1501 = vpow2.f32 %v970_v37 }
 0x36d   : > { %1503 = vpow2.f32 %v972_v23  ;;  %1108 = vmatprep.subr.bf16.mxu0 %v1051_v17  ;;  %1327 = vmatprep.subr.bf16.mxu1 %v1051_v17  ;;  %v1490_v7 = vpop.eup %1489 }
 0x36e   : > { %1109 = vmatpush2.bf16.xpose.msra.mxu0 %v1050_v24  ;;  %1343 = vmatpush2.bf16.xpose.msra.mxu1 %v1050_v24  ;;  %v1492_v54 = vpop.eup %1491 }
 0x36f   : > { %v276_v38 = vpop.permute.xlu0 %275 }
 0x370   : > { %v358_v59 = vadd.f32 %v1866_v55, %v276_v38  ;;  %v356_v63 = vadd.f32 %v2014_v9, %v276_v38 }
 0x371   : > { %v1494_v12 = vpop.eup %1493 }
 0x372   : > { %v1496_v21 = vpop.eup %1495  ;;  %v1313_v31 = vpack.c.bf16 %v358_v59, %v358_v59  ;;  %v1048_v28 = vpack.c.bf16 %v1494_v12, %v1490_v7  ;;  %v1312_v45 = vpack.c.bf16 %v356_v63, %v356_v63 }
 0x373   : > { %v271_v14 = vpop.permute.xlu0 %270  ;;  %v1049_v15 = vpack.c.bf16 %v1496_v21, %v1492_v54 }
 0x374   : > { %v352_v3 = vadd.f32 %v2013_v50, %v271_v14  ;;  %1124 = vmatprep.mubr.bf16.mxu1 %v1313_v31  ;;  %v350_v4 = vadd.f32 %v2015_v1, %v271_v14 }
 0x375   : > { %1110 = vmatprep.subr.bf16.mxu0 %v1049_v15  ;;  %1328 = vmatprep.subr.bf16.mxu1 %v1049_v15  ;;  %v1498_v39 = vpop.eup %1497 }
 0x376   : > { %v1311_v18 = vpack.c.bf16 %v352_v3, %v348_v32  ;;  %1111 = vmatpush2.bf16.xpose.msra.mxu0 %v1048_v28  ;;  %1344 = vmatpush2.bf16.xpose.msra.mxu1 %v1048_v28  ;;  %v1500_v40 = vpop.eup %1499  ;;  %v1310_v46 = vpack.c.bf16 %v350_v4, %v346_v25 }
 0x378   : > { %1114 = vmatprep.mubr.bf16.mxu0 %v1311_v18 }
 0x379   : > { %v1502_v55 = vpop.eup %1501 }
 0x37a   : > { %v1504_v41 = vpop.eup %1503  ;;  %v1046_v42 = vpack.c.bf16 %v1502_v55, %v1498_v39 }
 0x37b   : > { %v1047_v16 = vpack.c.bf16 %v1504_v41, %v1500_v40 }
 0x37d   : > { %1112 = vmatprep.subr.bf16.mxu0 %v1047_v16  ;;  %1329 = vmatprep.subr.bf16.mxu1 %v1047_v16 }
 0x37e   : > { %1113 = vmatpush2.bf16.xpose.msra.mxu0 %v1046_v42  ;;  %1345 = vmatpush2.bf16.xpose.msra.mxu1 %v1046_v42 }
 0x385   : > { %1115 = vmatmul.mubr.bf16.vlgmr.msra.gmra.mxu0 %v1310_v46  ;;  %1125 = vmatmul.mubr.bf16.vlgmr.msra.gmra.mxu1 %v1312_v45 }
 0x445   : > { %v1126_v58 = vpop.f32.mrf.mxu1  ;;  %v1116_v26 = vpop.f32.mrf.mxu0 }
 0x446   : > { %1505 = vrcp.f32 %v1126_v58 }
 0x447   : > { %v1128_v8 = vpop.f32.mrf.mxu1  ;;  %v1118_v5 = vpop.f32.mrf.mxu0 }
 0x448   : > { %1507 = vrcp.f32 %v1128_v8 }
 0x449   : > { %v1130_v52 = vpop.f32.mrf.mxu1  ;;  %v1120_v61 = vpop.f32.mrf.mxu0 }
 0x44b   : > { %v1131_v62 = vpop.f32.mrf.mxu1  ;;  %v1122_v48 = vpop.f32.mrf.mxu0 }
 0x453   : > { %v1506_v19 = vpop.eup %1505 }
 0x454   : > { %v1138_v10 = vrot.slane %v1506_v19, %v1137_v27 }
 0x455   : > { %v1508_v57 = vpop.eup %1507 }
 0x456   : > { %v1143_v43 = vmul.f32 %v1138_v10, %v1116_v26  ;;  %v1145_v6 = vmul.f32 %v1138_v10, %v1120_v61  ;;  %v1142_v44 = vrot.slane %v1508_v57, %v1137_v27 }
 0x458   : > { %v1155_v49 = vmul.f32 %v1154_v13, %v1143_v43  ;;  %v1157_v22 = vmul.f32 %v1154_v13, %v1145_v6  ;;  %v1144_v20 = vmul.f32 %v1142_v44, %v1118_v5  ;;  %v1146_v30 = vmul.f32 %v1142_v44, %v1122_v48 }
 0x45a   : > { %v1159_v47 = vadd.f32 %v1155_v49, %v2017_v29  ;;  %v1161_v35 = vadd.f32 %v1157_v22, %v2018_v0  ;;  %v1156_v36 = vmul.f32 %v1154_v13, %v1144_v20  ;;  %v1158_v51 = vmul.f32 %v1154_v13, %v1146_v30 }
 0x45c   : > { %1163 = vst [vmem:[%s1596_s27] sm:$0xff] %v1159_v47  ;;  %1165 = vst [vmem:[%s1596_s27 + $0x10] sm:$0xff] %v1161_v35  ;;  %v1160_v56 = vadd.f32 %v1156_v36, %v2019_v53  ;;  %v1162_v37 = vadd.f32 %v1158_v51, %v2020_v60 }
 0x45e   : > { %1164 = vst [vmem:[%s1596_s27 + $0x8] sm:$0xff] %v1160_v56  ;;  %1166 = vst [vmem:[%s1596_s27 + $0x18] sm:$0xff] %v1162_v37 }
 0x45f PF: > { %s15_s19 = sadd.s32 1, %s1533_s19   ;;  %s2021_s17 = smov %s1529_s18 }
 0x460   : > { %p12_p5 = scmp.ge.s32.totalorder %s15_s19, 4   ;;  %s2022_s18 = smov %s2024_s3 }
 0x462   :  { %14 = sbr.rel (!%p12_p5) target bundleno = 2 (0x2), region = 108 }
 0x467   :  { %1197 = vsyncmov [#allocation4] }
 0x46a   :  { %s1198_s21 = vpop.sfrf %1197 }
 0x46b   :  { %p1300_p6 = scmp.ne.s32.totalorder %s1198_s21, 0 }
 0x46d   :  { %1202 = shalt.err (%p1300_p6)  }

</bundles_post_ra>
